<compile_context>
chip_gen: v6e
topology: v6e:2x2x1
jax: 0.10.0
libtpu: 0.0.40
codegen_flags: <defaults>
</compile_context>

<pallas_src>
import functools

import jax
import jax.numpy as jnp
from jax.experimental import pallas as pl
from jax.experimental.pallas import tpu as pltpu


def fused_gcn_kernel(x_ref, a_ref, w_ref, b_ref, o_ref, h_ref, *,
                     c_in, order, support_len, seq_len, batch_block):
    """Fused graph diffusion + 1x1 conv for `batch_block` batch elements.

    x_ref : (B, V, C*L)            compute dtype  node-major input, lane = (c, l)
    a_ref : (S, V, V)              compute dtype  supports (grid-invariant)
    w_ref : (c_total*L, c_out*L)   compute dtype  kron(W.T, I_L)
    b_ref : (1, c_out*L)           float32        bias repeated over l
    o_ref : (B, V, c_out*L)        output dtype
    h_ref : (V, c_total*L)         compute dtype  VMEM scratch (channel concat)

    nconv semantics: x1[n,c,w,l] = sum_v A[w,v] * x[n,c,v,l]  (the PyTorch
    nconv transposes A before einsum('ncvl,vw->ncwl'), i.e. applies A[w, v]).
    """
    cl = c_in * seq_len
    for b in range(batch_block):
        x = x_ref[b]                                          # (V, C*L)
        h_ref[:, 0:cl] = x
        # Diffusion terms A_s^p x.  Interleave the support chains so that
        # consecutive MXU matmuls are independent (v5e/v6e MRF latency).
        # xk is re-cast to the compute dtype after every hop; with order=2 and
        # row-stochastic supports the compounded rounding stays small.
        xs = [x] * support_len
        for p in range(order):
            for s in range(support_len):
                xk = jnp.dot(a_ref[s], xs[s],
                             preferred_element_type=jnp.float32).astype(x.dtype)
                xs[s] = xk
                # channel-concat order matches torch: [x, A0 x, A0^2 x, A1 x, ...]
                blk = (1 + s * order + p) * cl
                h_ref[:, blk:blk + cl] = xk
        # One long-K epilogue matmul (K = c_total*L): accumulation stays inside
        # the MXU -- no partial-sum read-modify-write traffic over VMEM.
        acc = jnp.dot(h_ref[...], w_ref[...], preferred_element_type=jnp.float32)
        o_ref[b] = (acc + b_ref[...]).astype(o_ref.dtype)


def prepare_mlp_params(weight, bias, seq_len, *, compute_dtype=jnp.bfloat16):
    """Expand the 1x1-conv params for the node-major (V, (c, l)) layout.

    Hoisted out of the forward so it runs once per weight update:
      w_exp[k*L + l', o*L + l] = W[o, k] * delta(l', l)   (= kron(W.T, I_L))
      b_exp[0, o*L + l]        = bias[o]
    """
    c_out = weight.shape[0]
    eye = jnp.eye(seq_len, dtype=jnp.float32)
    w_exp = jnp.kron(weight.astype(jnp.float32).T, eye).astype(compute_dtype)
    b_exp = jnp.repeat(bias.astype(jnp.float32), seq_len).reshape(1, c_out * seq_len)
    return w_exp, b_exp


def _auto_batch_block(n, cap=8):
    """Largest divisor of n (<= cap) that still leaves a grid of length >= 2."""
    best = 1
    for d in range(1, min(n, cap) + 1):
        if n % d == 0 and n // d >= 2:
            best = d
    return best


def multi_gcn_forward(x, supports, w_exp, b_exp, *, order=2, batch_block=None,
                      compute_dtype=jnp.bfloat16, out_dtype=jnp.bfloat16):
    """x: (N, C, V, L); supports: (S, V, V); w_exp/b_exp from prepare_mlp_params."""
    N, C, V, L = x.shape
    S = supports.shape[0]
    c_total = (order * S + 1) * C
    assert w_exp.shape[0] == c_total * L, (w_exp.shape, c_total, L)
    c_out = w_exp.shape[1] // L
    assert w_exp.shape[1] == c_out * L and b_exp.shape == (1, c_out * L)

    if batch_block is None:
        batch_block = _auto_batch_block(N)
    if N % batch_block != 0:
        raise ValueError(f"batch_block={batch_block} must divide N={N}")

    # ---- layout plumbing (plain XLA glue, outside the kernel) ----
    # node-major, lane axis = (channel, time):  xv[n, v, c*L + l] = x[n, c, v, l]
    xv = jnp.transpose(x, (0, 2, 1, 3)).reshape(N, V, C * L).astype(compute_dtype)
    a = supports.astype(compute_dtype)

    # Pad the node dim to a sublane multiple once, here, rather than letting
    # Mosaic pad implicitly inside every matmul (e.g. V=207 -> 208).
    v_pad = ((V + 7) // 8) * 8
    if v_pad != V:
        xv = jnp.pad(xv, ((0, 0), (0, v_pad - V), (0, 0)))
        a = jnp.pad(a, ((0, 0), (0, v_pad - V), (0, v_pad - V)))

    kernel = functools.partial(fused_gcn_kernel, c_in=C, order=order,
                               support_len=S, seq_len=L, batch_block=batch_block)

    out_v = pl.pallas_call(
        kernel,
        out_shape=jax.ShapeDtypeStruct((N, v_pad, c_out * L), out_dtype),
        grid=(N // batch_block,),
        in_specs=[
            pl.BlockSpec((batch_block, v_pad, C * L), lambda n: (n, 0, 0)),  # x
            pl.BlockSpec((S, v_pad, v_pad), lambda n: (0, 0, 0)),            # supports
            pl.BlockSpec((c_total * L, c_out * L), lambda n: (0, 0)),        # kron(W.T, I_L)
            pl.BlockSpec((1, c_out * L), lambda n: (0, 0)),                  # bias
        ],
        out_specs=pl.BlockSpec((batch_block, v_pad, c_out * L), lambda n: (n, 0, 0)),
        scratch_shapes=[pltpu.VMEM((v_pad, c_total * L), compute_dtype)],
        compiler_params=pltpu.CompilerParams(
            dimension_semantics=("parallel",),
            vmem_limit_bytes=32 * 1024 * 1024,
        ),
    )(xv, a, w_exp.astype(compute_dtype), b_exp)
    # TODO(synk): on v7x (64 MiB VMEM) the grid-invariant supports/w_exp specs
    # could additionally request single-buffering (pipeline_mode=pl.Buffered(1)).

    # F.dropout with training=False (eval mode) is the identity.
    # TODO(synk): training-mode dropout would use pltpu.prng_seed/prng_random_bits.

    # (N, V, (c_out, L)) -> (N, c_out, V, L).  Consumers that accept the
    # node-major slab should take out_v[:, :V] directly and skip this pass.
    out_v = out_v[:, :V, :]
    return jnp.transpose(out_v.reshape(N, V, c_out, L), (0, 2, 1, 3))


def reference_multi_gcn(x, supports, weight, bias, *, order=2):
    """Pure-JAX f32 reference that mirrors the PyTorch forward (eval mode)."""
    def nconv(xx, A):
        A_t = jnp.swapaxes(A, -1, -2)                    # exactly as torch nconv
        return jnp.einsum('ncvl,vw->ncwl', xx, A_t)
    out = [x]
    for s in range(supports.shape[0]):
        a = supports[s]
        x1 = nconv(x, a)
        out.append(x1)
        for _ in range(2, order + 1):
            x2 = nconv(x1, a)
            out.append(x2)
            x1 = x2
    h = jnp.concatenate(out, axis=1)
    return jnp.einsum('ok,nkvl->novl', weight, h) + bias[None, :, None, None]


if __name__ == "__main__":
    key = jax.random.PRNGKey(0)
    kx, ka, kw, kb = jax.random.split(key, 4)

    # Small but lane-friendly toy sizes: C*L = 128 and c_out*L = 256 are lane
    # multiples; V = 12 exercises the wrapper's V -> 16 sublane padding path.
    N, C_IN, C_OUT, V, L = 2, 4, 8, 12, 32
    SUPPORT_LEN, ORDER = 3, 2
    C_TOT = (ORDER * SUPPORT_LEN + 1) * C_IN  # 28

    x = jax.random.normal(kx, (N, C_IN, V, L), dtype=jnp.float32)
    supports = jax.random.uniform(ka, (SUPPORT_LEN, V, V), dtype=jnp.float32)
    supports = supports / supports.sum(axis=-1, keepdims=True)  # row-stochastic

    # deterministic Conv2d(1x1)-style init (kaiming-uniform-like bounds)
    bound = 1.0 / (C_TOT ** 0.5)
    weight = jax.random.uniform(kw, (C_OUT, C_TOT), minval=-bound, maxval=bound,
                                dtype=jnp.float32)
    bias = jax.random.uniform(kb, (C_OUT,), minval=-bound, maxval=bound,
                              dtype=jnp.float32)

    ref = reference_multi_gcn(x, supports, weight, bias, order=ORDER)

    # Perf path: bf16 operands + bf16 output, f32 MXU accumulation (all gens).
    w_exp, b_exp = prepare_mlp_params(weight, bias, L, compute_dtype=jnp.bfloat16)
    fwd = jax.jit(functools.partial(multi_gcn_forward, order=ORDER))
    out = jax.block_until_ready(fwd(x, supports, w_exp, b_exp))
    assert out.shape == (N, C_OUT, V, L), out.shape
    err_bf16 = float(jnp.max(jnp.abs(out.astype(jnp.float32) - ref)))
    assert err_bf16 < 1e-1, f"bf16 path max abs err {err_bf16}"

    # Same path with several batch elements per grid step (batch-blocked grid).
    out_blk = jax.block_until_ready(
        multi_gcn_forward(x, supports, w_exp, b_exp, order=ORDER, batch_block=2))
    err_blk = float(jnp.max(jnp.abs(out_blk.astype(jnp.float32) - ref)))
    assert err_blk < 1e-1, f"batch-blocked path max abs err {err_blk}"

    # Tight structural check with f32 operands/output (verification only; bf16
    # is the recommended compute dtype on v5e/v6e/v7x alike).
    w32, b32 = prepare_mlp_params(weight, bias, L, compute_dtype=jnp.float32)
    out_f32 = jax.block_until_ready(
        multi_gcn_forward(x, supports, w32, b32, order=ORDER,
                          compute_dtype=jnp.float32, out_dtype=jnp.float32))
    err_f32 = float(jnp.max(jnp.abs(out_f32 - ref)))
    assert err_f32 < 1e-3, f"f32 path max abs err {err_f32}"

    print("KERNEL_OK")
</pallas_src>

<mosaic_0001>
module attributes {stable_mosaic.version = 11 : i64} {
  func.func @fused_gcn_kernel(%arg0: i32, %arg1: memref<1x16x128xbf16, #tpu.memory_space<vmem>>, %arg2: memref<3x16x16xbf16, #tpu.memory_space<vmem>>, %arg3: memref<896x256xbf16, #tpu.memory_space<vmem>>, %arg4: memref<1x256xf32, #tpu.memory_space<vmem>>, %arg5: memref<1x16x256xbf16, #tpu.memory_space<vmem>>, %arg6: memref<16x896xbf16, #tpu.memory_space<vmem>>) attributes {dimension_semantics = [#tpu.dimension_semantics<parallel>], iteration_bounds = array<i64: 2>, scalar_prefetch = 0 : i64, scratch_operands = 1 : i64, tpu.core_type = #tpu.core_type<tc>, window_params = [{transform_indices = @transform_0, window_bounds = array<i64: 1, 16, 128>}, {pipeline_mode = #tpu.pipeline_mode<synchronous>, transform_indices = @transform_1, window_bounds = array<i64: 3, 16, 16>}, {pipeline_mode = #tpu.pipeline_mode<synchronous>, transform_indices = @transform_2, window_bounds = array<i64: 896, 256>}, {pipeline_mode = #tpu.pipeline_mode<synchronous>, transform_indices = @transform_3, window_bounds = array<i64: 1, 256>}, {transform_indices = @transform_4, window_bounds = array<i64: 1, 16, 256>}]} {
    %c0 = arith.constant 0 : index
    %c0_0 = arith.constant 0 : index
    %c0_1 = arith.constant 0 : index
    %0 = vector.load %arg1[%c0, %c0_0, %c0_1] : memref<1x16x128xbf16, #tpu.memory_space<vmem>>, vector<1x16x128xbf16>
    %1 = vector.shape_cast %0 : vector<1x16x128xbf16> to vector<16x128xbf16>
    %c0_2 = arith.constant 0 : index
    %c0_3 = arith.constant 0 : index
    %2 = vector.load %arg6[%c0_2, %c0_3] : memref<16x896xbf16, #tpu.memory_space<vmem>>, vector<16x128xbf16>
    tpu.vector_store %arg6[%c0_2, %c0_3], %1 {strides = array<i32>} : memref<16x896xbf16, #tpu.memory_space<vmem>>, vector<16x128xbf16>,
    %c0_4 = arith.constant 0 : index
    %c0_5 = arith.constant 0 : index
    %c0_6 = arith.constant 0 : index
    %3 = vector.load %arg2[%c0_4, %c0_5, %c0_6] : memref<3x16x16xbf16, #tpu.memory_space<vmem>>, vector<1x16x16xbf16>
    %4 = vector.shape_cast %3 : vector<1x16x16xbf16> to vector<16x16xbf16>
    %cst = arith.constant dense<0.000000e+00> : vector<16x128xf32>
    %5 = tpu.matmul %4, %1, %cst {dimension_numbers = #tpu.dot_dimension_numbers<[1], [0], [0], [1], [0, 0, 1, 1], [], []>} : vector<16x16xbf16>, vector<16x128xbf16>, vector<16x128xf32> -> vector<16x128xf32>
    %6 = arith.truncf %5 : vector<16x128xf32> to vector<16x128xbf16>
    %c0_7 = arith.constant 0 : index
    %c128 = arith.constant 128 : index
    %7 = vector.load %arg6[%c0_7, %c128] : memref<16x896xbf16, #tpu.memory_space<vmem>>, vector<16x128xbf16>
    tpu.vector_store %arg6[%c0_7, %c128], %6 {strides = array<i32>} : memref<16x896xbf16, #tpu.memory_space<vmem>>, vector<16x128xbf16>,
    %c1 = arith.constant 1 : index
    %c0_8 = arith.constant 0 : index
    %c0_9 = arith.constant 0 : index
    %8 = vector.load %arg2[%c1, %c0_8, %c0_9] : memref<3x16x16xbf16, #tpu.memory_space<vmem>>, vector<1x16x16xbf16>
    %9 = vector.shape_cast %8 : vector<1x16x16xbf16> to vector<16x16xbf16>
    %cst_10 = arith.constant dense<0.000000e+00> : vector<16x128xf32>
    %10 = tpu.matmul %9, %1, %cst_10 {dimension_numbers = #tpu.dot_dimension_numbers<[1], [0], [0], [1], [0, 0, 1, 1], [], []>} : vector<16x16xbf16>, vector<16x128xbf16>, vector<16x128xf32> -> vector<16x128xf32>
    %11 = arith.truncf %10 : vector<16x128xf32> to vector<16x128xbf16>
    %c0_11 = arith.constant 0 : index
    %c384 = arith.constant 384 : index
    %12 = vector.load %arg6[%c0_11, %c384] : memref<16x896xbf16, #tpu.memory_space<vmem>>, vector<16x128xbf16>
    tpu.vector_store %arg6[%c0_11, %c384], %11 {strides = array<i32>} : memref<16x896xbf16, #tpu.memory_space<vmem>>, vector<16x128xbf16>,
    %c2 = arith.constant 2 : index
    %c0_12 = arith.constant 0 : index
    %c0_13 = arith.constant 0 : index
    %13 = vector.load %arg2[%c2, %c0_12, %c0_13] : memref<3x16x16xbf16, #tpu.memory_space<vmem>>, vector<1x16x16xbf16>
    %14 = vector.shape_cast %13 : vector<1x16x16xbf16> to vector<16x16xbf16>
    %cst_14 = arith.constant dense<0.000000e+00> : vector<16x128xf32>
    %15 = tpu.matmul %14, %1, %cst_14 {dimension_numbers = #tpu.dot_dimension_numbers<[1], [0], [0], [1], [0, 0, 1, 1], [], []>} : vector<16x16xbf16>, vector<16x128xbf16>, vector<16x128xf32> -> vector<16x128xf32>
    %16 = arith.truncf %15 : vector<16x128xf32> to vector<16x128xbf16>
    %c0_15 = arith.constant 0 : index
    %c640 = arith.constant 640 : index
    %17 = vector.load %arg6[%c0_15, %c640] : memref<16x896xbf16, #tpu.memory_space<vmem>>, vector<16x128xbf16>
    tpu.vector_store %arg6[%c0_15, %c640], %16 {strides = array<i32>} : memref<16x896xbf16, #tpu.memory_space<vmem>>, vector<16x128xbf16>,
    %c0_16 = arith.constant 0 : index
    %c0_17 = arith.constant 0 : index
    %c0_18 = arith.constant 0 : index
    %18 = vector.load %arg2[%c0_16, %c0_17, %c0_18] : memref<3x16x16xbf16, #tpu.memory_space<vmem>>, vector<1x16x16xbf16>
    %19 = vector.shape_cast %18 : vector<1x16x16xbf16> to vector<16x16xbf16>
    %cst_19 = arith.constant dense<0.000000e+00> : vector<16x128xf32>
    %20 = tpu.matmul %19, %6, %cst_19 {dimension_numbers = #tpu.dot_dimension_numbers<[1], [0], [0], [1], [0, 0, 1, 1], [], []>} : vector<16x16xbf16>, vector<16x128xbf16>, vector<16x128xf32> -> vector<16x128xf32>
    %21 = arith.truncf %20 : vector<16x128xf32> to vector<16x128xbf16>
    %c0_20 = arith.constant 0 : index
    %c256 = arith.constant 256 : index
    %22 = vector.load %arg6[%c0_20, %c256] : memref<16x896xbf16, #tpu.memory_space<vmem>>, vector<16x128xbf16>
    tpu.vector_store %arg6[%c0_20, %c256], %21 {strides = array<i32>} : memref<16x896xbf16, #tpu.memory_space<vmem>>, vector<16x128xbf16>,
    %c1_21 = arith.constant 1 : index
    %c0_22 = arith.constant 0 : index
    %c0_23 = arith.constant 0 : index
    %23 = vector.load %arg2[%c1_21, %c0_22, %c0_23] : memref<3x16x16xbf16, #tpu.memory_space<vmem>>, vector<1x16x16xbf16>
    %24 = vector.shape_cast %23 : vector<1x16x16xbf16> to vector<16x16xbf16>
    %cst_24 = arith.constant dense<0.000000e+00> : vector<16x128xf32>
    %25 = tpu.matmul %24, %11, %cst_24 {dimension_numbers = #tpu.dot_dimension_numbers<[1], [0], [0], [1], [0, 0, 1, 1], [], []>} : vector<16x16xbf16>, vector<16x128xbf16>, vector<16x128xf32> -> vector<16x128xf32>
    %26 = arith.truncf %25 : vector<16x128xf32> to vector<16x128xbf16>
    %c0_25 = arith.constant 0 : index
    %c512 = arith.constant 512 : index
    %27 = vector.load %arg6[%c0_25, %c512] : memref<16x896xbf16, #tpu.memory_space<vmem>>, vector<16x128xbf16>
    tpu.vector_store %arg6[%c0_25, %c512], %26 {strides = array<i32>} : memref<16x896xbf16, #tpu.memory_space<vmem>>, vector<16x128xbf16>,
    %c2_26 = arith.constant 2 : index
    %c0_27 = arith.constant 0 : index
    %c0_28 = arith.constant 0 : index
    %28 = vector.load %arg2[%c2_26, %c0_27, %c0_28] : memref<3x16x16xbf16, #tpu.memory_space<vmem>>, vector<1x16x16xbf16>
    %29 = vector.shape_cast %28 : vector<1x16x16xbf16> to vector<16x16xbf16>
    %cst_29 = arith.constant dense<0.000000e+00> : vector<16x128xf32>
    %30 = tpu.matmul %29, %16, %cst_29 {dimension_numbers = #tpu.dot_dimension_numbers<[1], [0], [0], [1], [0, 0, 1, 1], [], []>} : vector<16x16xbf16>, vector<16x128xbf16>, vector<16x128xf32> -> vector<16x128xf32>
    %31 = arith.truncf %30 : vector<16x128xf32> to vector<16x128xbf16>
    %c0_30 = arith.constant 0 : index
    %c768 = arith.constant 768 : index
    %32 = vector.load %arg6[%c0_30, %c768] : memref<16x896xbf16, #tpu.memory_space<vmem>>, vector<16x128xbf16>
    tpu.vector_store %arg6[%c0_30, %c768], %31 {strides = array<i32>} : memref<16x896xbf16, #tpu.memory_space<vmem>>, vector<16x128xbf16>,
    %c0_31 = arith.constant 0 : index
    %c0_32 = arith.constant 0 : index
    %33 = vector.load %arg6[%c0_31, %c0_32] : memref<16x896xbf16, #tpu.memory_space<vmem>>, vector<16x896xbf16>
    %c0_33 = arith.constant 0 : index
    %c0_34 = arith.constant 0 : index
    %34 = vector.load %arg3[%c0_33, %c0_34] : memref<896x256xbf16, #tpu.memory_space<vmem>>, vector<896x256xbf16>
    %cst_35 = arith.constant dense<0.000000e+00> : vector<16x256xf32>
    %35 = tpu.matmul %33, %34, %cst_35 {dimension_numbers = #tpu.dot_dimension_numbers<[1], [0], [0], [1], [0, 0, 1, 1], [], []>} : vector<16x896xbf16>, vector<896x256xbf16>, vector<16x256xf32> -> vector<16x256xf32>
    %c0_36 = arith.constant 0 : index
    %c0_37 = arith.constant 0 : index
    %36 = vector.load %arg4[%c0_36, %c0_37] : memref<1x256xf32, #tpu.memory_space<vmem>>, vector<1x256xf32>
    %37 = vector.broadcast %36 : vector<1x256xf32> to vector<16x256xf32>
    %38 = arith.addf %35, %37 : vector<16x256xf32>
    %39 = arith.truncf %38 : vector<16x256xf32> to vector<16x256xbf16>
    %c0_38 = arith.constant 0 : index
    %c0_39 = arith.constant 0 : index
    %c0_40 = arith.constant 0 : index
    %40 = vector.load %arg5[%c0_38, %c0_39, %c0_40] : memref<1x16x256xbf16, #tpu.memory_space<vmem>>, vector<1x16x256xbf16>
    %41 = vector.shape_cast %40 : vector<1x16x256xbf16> to vector<16x256xbf16>
    %42 = vector.shape_cast %39 : vector<16x256xbf16> to vector<1x16x256xbf16>
    tpu.vector_store %arg5[%c0_38, %c0_39, %c0_40], %42 {strides = array<i32>} : memref<1x16x256xbf16, #tpu.memory_space<vmem>>, vector<1x16x256xbf16>,
    return
  }
  func.func @transform_0(%arg0: i32) -> (i32, i32, i32) {
    %c0_i32 = arith.constant 0 : i32
    %c0_i32_0 = arith.constant 0 : i32
    %c0_i32_1 = arith.constant 0 : i32
    return %arg0, %c0_i32, %c0_i32_0 : i32, i32, i32
  }
  func.func @transform_1(%arg0: i32) -> (i32, i32, i32) {
    %c0_i32 = arith.constant 0 : i32
    %c0_i32_0 = arith.constant 0 : i32
    %c0_i32_1 = arith.constant 0 : i32
    %c0_i32_2 = arith.constant 0 : i32
    return %c0_i32, %c0_i32_0, %c0_i32_1 : i32, i32, i32
  }
  func.func @transform_2(%arg0: i32) -> (i32, i32) {
    %c0_i32 = arith.constant 0 : i32
    %c0_i32_0 = arith.constant 0 : i32
    %c0_i32_1 = arith.constant 0 : i32
    return %c0_i32, %c0_i32_0 : i32, i32
  }
  func.func @transform_3(%arg0: i32) -> (i32, i32) {
    %c0_i32 = arith.constant 0 : i32
    %c0_i32_0 = arith.constant 0 : i32
    %c0_i32_1 = arith.constant 0 : i32
    return %c0_i32, %c0_i32_0 : i32, i32
  }
  func.func @transform_4(%arg0: i32) -> (i32, i32, i32) {
    %c0_i32 = arith.constant 0 : i32
    %c0_i32_0 = arith.constant 0 : i32
    %c0_i32_1 = arith.constant 0 : i32
    return %arg0, %c0_i32, %c0_i32_0 : i32, i32, i32
  }
}

</mosaic_0001>

<bundles_post_ra>
// kernel: multi_gcn_forward.1
= control target key start
LH: loop header
LB: loop body
LE: loop exit
PB: predicated region body
PF: predicated region fallthrough
CT: control target
= control target key end

     0   :  { %9 = vsyncpa [#allocation4], 0  ;;  %s2083_s15 = smov 0   ;;  %s2159_s0 = inlined_call_operand.vmem [shape: bf16[2,16,128], index: 0, kind: input, shape index: {}]   ;;  %s2160_s1 = inlined_call_operand.vmem [shape: bf16[3,16,16], index: 1, kind: input, shape index: {}]   ;;  %s2161_s2 = inlined_call_operand.hbm [shape: bf16[896,256], index: 2, kind: input, shape index: {}]   ;;  %s2162_s3 = inlined_call_operand.vmem [shape: f32[1,256], index: 3, kind: input, shape index: {}]   ;;  %s2163_s4 = inlined_call_operand.vmem [shape: bf16[2,16,256], index: 4, kind: output, shape index: {}]  }
   0x1 LB: > { %s2089_s16 = sadd.s32 4294967295, %s2050_s15   ;;  %p1576_p0 = scmp.ge.s32.totalorder %s2050_s15, 1  ;;  %s2050_s15 = sphi %s2083_s15, %s15_s15  }
   0x2   : > { %p135_p1 = scmp.lt.s32.totalorder %s2050_s15, 3  ;;  %s2052_s17 = smov [#allocation3]  }
   0x3   : > { %s150_s18 = sshll.u32 %s2052_s17, 4  ;;  %p1813_p3 = scmp.eq.s32.totalorder %s2089_s16, 0  ;;  %s151_s18 = int_to_ptr.vmem [resolvable:$true] %s150_s18 }
   0x4   : > { %p2093_p2 = pnand %p1576_p0, %p135_p1  ;;  %s2025_s20 = scalar_lea.vmem %s151_s18, 14336 }
   0x5   : > { %p2026_p7 = scmp.ne.s32.totalorder %s151_s18, %s2025_s20  ;;  %p2033_p10 = scmp.lt.s32.totalorder %s151_s18, %s151_s18 }
   0x6   : > { %p1809_p4 = pneg %p2093_p2  ;;  %p2034_p11 = scmp.lt.s32.totalorder %s2025_s20, %s2025_s20 }
   0x8   : > { %p1810_p5 = pnand %p1813_p3, %p1809_p4  ;;  %p2035_p12 = por %p2034_p11, %p2033_p10 }
   0xa   : > { %p2016_p6 = pneg %p1810_p5 }
   0xc   : > { %p2028_p8 = pnand %p2026_p7, %p2016_p6 }
   0xe   : > { %p2029_p9 = pneg %p2028_p8 }
  0x10   : > { %p2036_p13 = pnand %p2035_p12, %p2029_p9 }
  0x12   : > { %2039 = shalt.err (!%p2036_p13)
}
  0x13   : > { %s2053_s21 = smov 128   ;;  %s2054_s22 = smov 8  }
  0x14   : > { %1812 = dma.hbm_to_vmem [thread:$0]  (!%p1810_p5), %s2161_s2, 14336, %s151_s18, [#allocation4], %s2053_s21, %s2053_s21, %s2054_s22  }
  0x15   : > { %177 = sbr.rel (%p2093_p2) target bundleno = 683 (0x2ab), region = 36 }
  0x1a   : > { %2045 = dma.done.wait (%p1813_p3), [#allocation4], 14336  }
  0x1b   : > { %2047 = vsyncadd (%p1813_p3), [#allocation4], 4294952960  ;;  %p203_p0 = scmp.lt.s32.totalorder %s2089_s16, 1  ;;  %v2055_v0 = vmov 0.0   ;;  %vm2056_vm0 = vmmov 0   ;;  %v1830_v4 = vld [vmem:[%s2160_s1] sm:$0xff]  }
  0x1c   : > { %1769 = vmatprep.subr.bf16.mxu1 %v2055_v0  ;;  %1771 = vmatprep.mubr.msk.bf16.mxu1 %vm2056_vm0, %v2055_v0  ;;  %vm231_vm1 = vcmask 130048   ;;  %v1831_v5 = vld [vmem:[%s2160_s1 + $0x8] sm:$0xff]   ;;  %v1832_v6 = vld [vmem:[%s2160_s1 + $0x10] sm:$0xff]   ;;  %v1833_v14 = vld [vmem:[%s2160_s1] sm:$0xff]  }
  0x1d   : > { %s2166_s16 = smov (!%p203_p0, %s2089_s16), 1  ;;  %1793 = vmatprep.subr.bf16.mxu0 %v2055_v0  ;;  %1795 = vmatprep.mubr.msk.bf16.mxu0 %vm2056_vm0, %v2055_v0  ;;  %v1837_v19 = vld [vmem:[#allocation3 + $0x74] ss:$8 sps:$4 sm:$0xff]   ;;  %v1835_v24 = vld [vmem:[#allocation3 + $0x70] ss:$8 sps:$4 sm:$0xff]  }
  0x1e   : > { %s1741_s25 = sshll.u32 %s2166_s16, 3  ;;  %v1834_v22 = vld [vmem:[%s2160_s1 + $0x8] sm:$0xff]   ;;  %v1843_v25 = vld [vmem:[#allocation3 + $0x64] ss:$8 sps:$4 sm:$0xff]   ;;  %v1841_v30 = vld [vmem:[#allocation3 + $0x60] ss:$8 sps:$4 sm:$0xff]  }
  0x1f   : > { %s207_s28 = scalar_lea.vmem %s2159_s0, %s1741_s25  ;;  %v1846_v31 = vld [vmem:[#allocation3 + $0x54] ss:$8 sps:$4 sm:$0xff]   ;;  %v1844_v38 = vld [vmem:[#allocation3 + $0x50] ss:$8 sps:$4 sm:$0xff]   ;;  %v1849_v40 = vld [vmem:[#allocation3 + $0x44] ss:$8 sps:$4 sm:$0xff]  }
  0x20   : > { %v214_v1 = vld [vmem:[%s207_s28] sm:$0xf]  ;;  %v215_v2 = vld [vmem:[%s207_s28 + $0x4] sm:$0xf]  ;;  %v1889_v33 = vld [vmem:[#allocation3 + $0x174] ss:$8 sps:$4 sm:$0xff]  }
  0x21   : > { %216 = vst [vmem:[#allocation2] sm:$0xf] %v214_v1  ;;  %217 = vst [vmem:[#allocation2 + $0x1c] sm:$0xf] %v215_v2  ;;  %v1586_v3 = vcombine.low %v214_v1, %v215_v2  ;;  %v1856_v37 = vld [vmem:[%s2160_s1 + $0x10] sm:$0xff]   ;;  %s1742_s19 = sshll.u32 %s2166_s16, 4 }
  0x22   : > { %v1887_v39 = vld [vmem:[#allocation3 + $0x170] ss:$8 sps:$4 sm:$0xff]   ;;  %v1892_v41 = vld [vmem:[#allocation3 + $0x164] ss:$8 sps:$4 sm:$0xff]   ;;  %v1847_v42 = vld [vmem:[#allocation3 + $0x40] ss:$8 sps:$4 sm:$0xff]   ;;  %s212_s22 = scalar_lea.vmem %s2163_s4, %s1742_s19 }
  0x23   : > { %1770 = vmatpush3.bf16.msra.mxu1 %v1586_v3  ;;  %v1890_v43 = vld [vmem:[#allocation3 + $0x160] ss:$8 sps:$4 sm:$0xff]   ;;  %v1852_v44 = vld [vmem:[#allocation3 + $0x34] ss:$8 sps:$4 sm:$0xff]   ;;  %v1850_v46 = vld [vmem:[#allocation3 + $0x30] ss:$8 sps:$4 sm:$0xff]  }
  0x24   : > { %1775 = vmatprep.subr.bf16.mxu1 %v2055_v0  ;;  %v1895_v45 = vld [vmem:[#allocation3 + $0x154] ss:$8 sps:$4 sm:$0xff]   ;;  %v1893_v47 = vld [vmem:[#allocation3 + $0x150] ss:$8 sps:$4 sm:$0xff]   ;;  %v1855_v48 = vld [vmem:[#allocation3 + $0x24] ss:$8 sps:$4 sm:$0xff]  }
  0x25   : > { %v1901_v49 = vld [vmem:[#allocation3 + $0x144] ss:$8 sps:$4 sm:$0xff]   ;;  %v1853_v50 = vld [vmem:[#allocation3 + $0x20] ss:$8 sps:$4 sm:$0xff]   ;;  %v1859_v52 = vld [vmem:[#allocation3 + $0x14] ss:$8 sps:$4 sm:$0xff]  }
  0x26   : > { %1772 = vmatmul.mubr.msk.bf16.vlgmr.msra.gmra.mxu1 %vm231_vm1, %v1830_v4  ;;  %v1899_v51 = vld [vmem:[#allocation3 + $0x140] ss:$8 sps:$4 sm:$0xff]   ;;  %v1907_v53 = vld [vmem:[#allocation3 + $0x134] ss:$8 sps:$4 sm:$0xff]   ;;  %v1857_v54 = vld [vmem:[#allocation3 + $0x10] ss:$8 sps:$4 sm:$0xff]  }
  0x27   : > { %1776 = vmatpush3.bf16.msra.mxu1 %v1586_v3  ;;  %1777 = vmatprep.mubr.msk.bf16.mxu1 %vm2056_vm0, %v2055_v0  ;;  %v1905_v55 = vld [vmem:[#allocation3 + $0x130] ss:$8 sps:$4 sm:$0xff]   ;;  %v1862_v56 = vld [vmem:[#allocation3 + $0x4] ss:$8 sps:$4 sm:$0xff]   ;;  %v1860_v58 = vld [vmem:[#allocation3] ss:$8 sps:$4 sm:$0xff]  }
  0x28   : > { %1781 = vmatprep.subr.bf16.mxu1 %v2055_v0  ;;  %v1913_v57 = vld [vmem:[#allocation3 + $0x124] ss:$8 sps:$4 sm:$0xff]   ;;  %v1911_v59 = vld [vmem:[#allocation3 + $0x120] ss:$8 sps:$4 sm:$0xff]   ;;  %v1865_v60 = vld [vmem:[#allocation3 + $0xf4] ss:$8 sps:$4 sm:$0xff]  }
  0x29   : > { %v1919_v61 = vld [vmem:[#allocation3 + $0x114] ss:$8 sps:$4 sm:$0xff]   ;;  %v1863_v62 = vld [vmem:[#allocation3 + $0xf0] ss:$8 sps:$4 sm:$0xff]   ;;  %v1925_v1 = vld [vmem:[#allocation3 + $0x104] ss:$8 sps:$4 sm:$0xff]  }
  0x2a   : > { %v1917_v63 = vld [vmem:[#allocation3 + $0x110] ss:$8 sps:$4 sm:$0xff]   ;;  %v1866_v2 = vld [vmem:[#allocation3 + $0xe0] ss:$8 sps:$4 sm:$0xff]   ;;  %v1871_v4 = vld [vmem:[#allocation3 + $0xd4] ss:$8 sps:$4 sm:$0xff]  }
  0x2e   : > { %1778 = vmatmul.mubr.msk.bf16.vlgmr.msra.gmra.mxu1 %vm231_vm1, %v1831_v5  ;;  %v1931_v5 = vld [vmem:[#allocation3 + $0x1f4] ss:$8 sps:$4 sm:$0xff]  }
  0x2f   : > { %1782 = vmatpush3.bf16.msra.mxu1 %v1586_v3  ;;  %1783 = vmatprep.mubr.msk.bf16.mxu1 %vm2056_vm0, %v2055_v0  ;;  %v1923_v3 = vld [vmem:[#allocation3 + $0x100] ss:$8 sps:$4 sm:$0xff]  }
  0x30   : > { %1787 = vmatprep.subr.bf16.mxu1 %v2055_v0 }
  0x36   : > { %1784 = vmatmul.mubr.msk.bf16.vlgmr.msra.gmra.mxu1 %vm231_vm1, %v1832_v6  ;;  %v1869_v6 = vld [vmem:[#allocation3 + $0xd0] ss:$8 sps:$4 sm:$0xff]  }
  0x37   : > { %1789 = vmatprep.mubr.msk.bf16.mxu1 %vm2056_vm0, %v2055_v0 }
  0xe6   : > { %v269_v7 = vpop.f32.mrf.mxu1 }
  0xe7   : > { %v1743_v8 = vpack.c.bf16 %v269_v7, %v269_v7 }
  0xe8   : > { %v1773_v9 = vpop.f32.mrf.mxu1 }
  0xe9   : > { %284 = vst [vmem:[#allocation2 + $0x4] sm:$0xf] %v1743_v8  ;;  %v1874_v8 = vld [vmem:[#allocation3 + $0xc4] ss:$8 sps:$4 sm:$0xff]  }
  0xea   : > { %v272_v10 = vpop.f32.mrf.mxu1  ;;  %v1937_v9 = vld [vmem:[#allocation3 + $0x1e4] ss:$8 sps:$4 sm:$0xff]  }
  0xeb   : > { %v276_v11 = vpack.c.bf16 %v272_v10, %v269_v7  ;;  %v1744_v12 = vpack.c.bf16 %v272_v10, %v272_v10  ;;  %v1929_v7 = vld [vmem:[#allocation3 + $0x1f0] ss:$8 sps:$4 sm:$0xff]   ;;  %v1872_v10 = vld [vmem:[#allocation3 + $0xc0] ss:$8 sps:$4 sm:$0xff]  }
  0xec   : > { %v1774_v13 = vpop.f32.mrf.mxu1 }
  0xed   : > { %285 = vst [vmem:[#allocation2 + $0x20] sm:$0xf] %v1744_v12  ;;  %1788 = vmatpush3.bf16.msra.mxu1 %v276_v11  ;;  %v1935_v11 = vld [vmem:[#allocation3 + $0x1e0] ss:$8 sps:$4 sm:$0xff]   ;;  %v1877_v12 = vld [vmem:[#allocation3 + $0xb4] ss:$8 sps:$4 sm:$0xff]  }
  0xee   : > { %v331_v15 = vpop.f32.mrf.mxu1  ;;  %1799 = vmatprep.subr.bf16.mxu1 %v2055_v0  ;;  %v1943_v13 = vld [vmem:[#allocation3 + $0x1d4] ss:$8 sps:$4 sm:$0xff]  }
  0xef   : > { %v1745_v16 = vpack.c.bf16 %v331_v15, %v331_v15 }
  0xf0   : > { %v1779_v17 = vpop.f32.mrf.mxu1  ;;  %1790 = vmatmul.mubr.msk.bf16.vlgmr.msra.gmra.mxu1 %vm231_vm1, %v1833_v14  ;;  %v1875_v14 = vld [vmem:[#allocation3 + $0xb0] ss:$8 sps:$4 sm:$0xff]  }
  0xf1   : > { %346 = vst [vmem:[#allocation2 + $0xc] sm:$0xf] %v1745_v16  ;;  %1801 = vmatprep.mubr.msk.bf16.mxu1 %vm2056_vm0, %v2055_v0  ;;  %v1868_v0 = vld [vmem:[#allocation3 + $0xe4] ss:$8 sps:$4 sm:$0xff]  }
  0xf2   : > { %v334_v18 = vpop.f32.mrf.mxu1  ;;  %v1880_v16 = vld [vmem:[#allocation3 + $0xa4] ss:$8 sps:$4 sm:$0xff]  }
  0xf3   : > { %v1746_v20 = vpack.c.bf16 %v334_v18, %v334_v18  ;;  %v338_v21 = vpack.c.bf16 %v334_v18, %v331_v15  ;;  %v1941_v15 = vld [vmem:[#allocation3 + $0x1d0] ss:$8 sps:$4 sm:$0xff]   ;;  %v1949_v17 = vld [vmem:[#allocation3 + $0x1c4] ss:$8 sps:$4 sm:$0xff]   ;;  %v1878_v18 = vld [vmem:[#allocation3 + $0xa0] ss:$8 sps:$4 sm:$0xff]  }
  0xf4   : > { %v1780_v23 = vpop.f32.mrf.mxu1  ;;  %v1840_v27 = vld [vmem:[#allocation2 + $0x4] ss:$28 sps:$4 sm:$0xff]  }
  0xf5   : > { %347 = vst [vmem:[#allocation2 + $0x28] sm:$0xf] %v1746_v20  ;;  %1794 = vmatpush3.bf16.msra.mxu0 %v338_v21  ;;  %v1883_v20 = vld [vmem:[#allocation3 + $0x94] ss:$8 sps:$4 sm:$0xff]   ;;  %v1881_v21 = vld [vmem:[#allocation3 + $0x90] ss:$8 sps:$4 sm:$0xff]  }
  0xf6   : > { %1321 = vmatprep.subr.bf16.mxu0 %v1837_v19  ;;  %v393_v26 = vpop.f32.mrf.mxu1  ;;  %v1947_v19 = vld [vmem:[#allocation3 + $0x1c0] ss:$8 sps:$4 sm:$0xff]   ;;  %v1955_v23 = vld [vmem:[#allocation3 + $0x1b4] ss:$8 sps:$4 sm:$0xff]  }
  0xf7   : > { %v1747_v28 = vpack.c.bf16 %v393_v26, %v393_v26 }
  0xf8   : > { %1796 = vmatmul.mubr.msk.bf16.vlgmr.msra.gmra.mxu0 %vm231_vm1, %v1834_v22  ;;  %v1785_v29 = vpop.f32.mrf.mxu1  ;;  %v1886_v22 = vld [vmem:[#allocation3 + $0x84] ss:$8 sps:$4 sm:$0xff]  }
  0xf9   : > { %1322 = vmatpush1.bf16.msra.mxu0 %v1835_v24  ;;  %1353 = vmatprep.mubr.bf16.mxu0 %v1840_v27  ;;  %408 = vst [vmem:[#allocation2 + $0x14] sm:$0xf] %v1747_v28  ;;  %v1953_v24 = vld [vmem:[#allocation3 + $0x1b0] ss:$8 sps:$4 sm:$0xff]   ;;  %v1961_v27 = vld [vmem:[#allocation3 + $0x1a4] ss:$8 sps:$4 sm:$0xff]  }
  0xfa   : > { %1323 = vmatprep.subr.bf16.mxu0 %v1843_v25  ;;  %v396_v32 = vpop.f32.mrf.mxu1  ;;  %v1884_v25 = vld [vmem:[#allocation3 + $0x80] ss:$8 sps:$4 sm:$0xff]   ;;  %v1896_v29 = vld [vmem:[#allocation3 + $0x270] ss:$8 sps:$4 sm:$0xff]  }
  0xfb   : > { %v400_v34 = vpack.c.bf16 %v396_v32, %v393_v26  ;;  %v1748_v35 = vpack.c.bf16 %v396_v32, %v396_v32  ;;  %v1898_v26 = vld [vmem:[#allocation3 + $0x274] ss:$8 sps:$4 sm:$0xff]   ;;  %v1959_v28 = vld [vmem:[#allocation3 + $0x1a0] ss:$8 sps:$4 sm:$0xff]  }
  0xfc   : > { %v1786_v36 = vpop.f32.mrf.mxu1  ;;  %v1967_v32 = vld [vmem:[#allocation3 + $0x194] ss:$8 sps:$4 sm:$0xff]  }
  0xfd   : > { %1324 = vmatpush1.bf16.msra.mxu0 %v1841_v30  ;;  %409 = vst [vmem:[#allocation2 + $0x30] sm:$0xf] %v1748_v35  ;;  %1800 = vmatpush3.bf16.msra.mxu1 %v400_v34  ;;  %v1838_v30 = vld [vmem:[#allocation2] ss:$28 sps:$4 sm:$0xff]   ;;  %v1910_v35 = vld [vmem:[#allocation3 + $0x254] ss:$8 sps:$4 sm:$0xff]  }
  0xfe   : > { %1325 = vmatprep.subr.bf16.mxu0 %v1846_v31  ;;  %1364 = vmatprep.subr.bf16.mxu1 %v1889_v33  ;;  %v1904_v31 = vld [vmem:[#allocation3 + $0x264] ss:$8 sps:$4 sm:$0xff]   ;;  %v1965_v33 = vld [vmem:[#allocation3 + $0x190] ss:$8 sps:$4 sm:$0xff]   ;;  %v1902_v34 = vld [vmem:[#allocation3 + $0x260] ss:$8 sps:$4 sm:$0xff]  }
  0xff   : > { %v1973_v36 = vld [vmem:[#allocation3 + $0x184] ss:$8 sps:$4 sm:$0xff]  }
 0x100   : > { %1802 = vmatmul.mubr.msk.bf16.vlgmr.msra.gmra.mxu1 %vm231_vm1, %v1856_v37  ;;  %v1971_v37 = vld [vmem:[#allocation3 + $0x180] ss:$8 sps:$4 sm:$0xff]  }
 0x101   : > { %1326 = vmatpush1.bf16.msra.mxu0 %v1844_v38  ;;  %1365 = vmatpush1.bf16.msra.mxu1 %v1887_v39  ;;  %v1908_v38 = vld [vmem:[#allocation3 + $0x250] ss:$8 sps:$4 sm:$0xff]   ;;  %v1916_v39 = vld [vmem:[#allocation3 + $0x244] ss:$8 sps:$4 sm:$0xff]  }
 0x102   : > { %1327 = vmatprep.subr.bf16.mxu0 %v1849_v40  ;;  %1366 = vmatprep.subr.bf16.mxu1 %v1892_v41  ;;  %v1982_v40 = vld [vmem:[#allocation3 + $0x374] ss:$8 sps:$4 sm:$0xff]   ;;  %v1914_v41 = vld [vmem:[#allocation3 + $0x240] ss:$8 sps:$4 sm:$0xff]  }
 0x105   : > { %1328 = vmatpush1.bf16.msra.mxu0 %v1847_v42  ;;  %1367 = vmatpush1.bf16.msra.mxu1 %v1890_v43  ;;  %v1922_v42 = vld [vmem:[#allocation3 + $0x234] ss:$8 sps:$4 sm:$0xff]   ;;  %v1920_v43 = vld [vmem:[#allocation3 + $0x230] ss:$8 sps:$4 sm:$0xff]  }
 0x106   : > { %1329 = vmatprep.subr.bf16.mxu0 %v1852_v44  ;;  %1368 = vmatprep.subr.bf16.mxu1 %v1895_v45  ;;  %v1928_v44 = vld [vmem:[#allocation3 + $0x224] ss:$8 sps:$4 sm:$0xff]   ;;  %v1926_v45 = vld [vmem:[#allocation3 + $0x220] ss:$8 sps:$4 sm:$0xff]  }
 0x109   : > { %1330 = vmatpush1.bf16.msra.mxu0 %v1850_v46  ;;  %1369 = vmatpush1.bf16.msra.mxu1 %v1893_v47  ;;  %v1934_v46 = vld [vmem:[#allocation3 + $0x214] ss:$8 sps:$4 sm:$0xff]   ;;  %v1932_v47 = vld [vmem:[#allocation3 + $0x210] ss:$8 sps:$4 sm:$0xff]  }
 0x10a   : > { %1331 = vmatprep.subr.bf16.mxu0 %v1855_v48  ;;  %1370 = vmatprep.subr.bf16.mxu1 %v1901_v49  ;;  %v1940_v48 = vld [vmem:[#allocation3 + $0x204] ss:$8 sps:$4 sm:$0xff]   ;;  %v1938_v49 = vld [vmem:[#allocation3 + $0x200] ss:$8 sps:$4 sm:$0xff]  }
 0x10d   : > { %1332 = vmatpush1.bf16.msra.mxu0 %v1853_v50  ;;  %1371 = vmatpush1.bf16.msra.mxu1 %v1899_v51  ;;  %v1946_v50 = vld [vmem:[#allocation3 + $0x2f4] ss:$8 sps:$4 sm:$0xff]   ;;  %v1944_v51 = vld [vmem:[#allocation3 + $0x2f0] ss:$8 sps:$4 sm:$0xff]  }
 0x10e   : > { %1333 = vmatprep.subr.bf16.mxu0 %v1859_v52  ;;  %1372 = vmatprep.subr.bf16.mxu1 %v1907_v53  ;;  %v1952_v52 = vld [vmem:[#allocation3 + $0x2e4] ss:$8 sps:$4 sm:$0xff]   ;;  %v1950_v53 = vld [vmem:[#allocation3 + $0x2e0] ss:$8 sps:$4 sm:$0xff]  }
 0x111   : > { %1334 = vmatpush1.bf16.msra.mxu0 %v1857_v54  ;;  %1373 = vmatpush1.bf16.msra.mxu1 %v1905_v55  ;;  %v1958_v54 = vld [vmem:[#allocation3 + $0x2d4] ss:$8 sps:$4 sm:$0xff]   ;;  %v1956_v55 = vld [vmem:[#allocation3 + $0x2d0] ss:$8 sps:$4 sm:$0xff]  }
 0x112   : > { %1335 = vmatprep.subr.bf16.mxu0 %v1862_v56  ;;  %1374 = vmatprep.subr.bf16.mxu1 %v1913_v57  ;;  %v1964_v56 = vld [vmem:[#allocation3 + $0x2c4] ss:$8 sps:$4 sm:$0xff]   ;;  %v1962_v57 = vld [vmem:[#allocation3 + $0x2c0] ss:$8 sps:$4 sm:$0xff]  }
 0x115   : > { %1336 = vmatpush1.bf16.msra.mxu0 %v1860_v58  ;;  %1375 = vmatpush1.bf16.msra.mxu1 %v1911_v59  ;;  %v1970_v58 = vld [vmem:[#allocation3 + $0x2b4] ss:$8 sps:$4 sm:$0xff]   ;;  %v1968_v59 = vld [vmem:[#allocation3 + $0x2b0] ss:$8 sps:$4 sm:$0xff]  }
 0x116   : > { %1337 = vmatprep.subr.bf16.mxu0 %v1865_v60  ;;  %1376 = vmatprep.subr.bf16.mxu1 %v1919_v61  ;;  %v1976_v60 = vld [vmem:[#allocation3 + $0x2a4] ss:$8 sps:$4 sm:$0xff]   ;;  %v1974_v61 = vld [vmem:[#allocation3 + $0x2a0] ss:$8 sps:$4 sm:$0xff]  }
 0x119   : > { %1338 = vmatpush2.bf16.msra.mxu0 %v1863_v62  ;;  %1377 = vmatpush1.bf16.msra.mxu1 %v1917_v63  ;;  %v1985_v62 = vld [vmem:[#allocation3 + $0x294] ss:$8 sps:$4 sm:$0xff]   ;;  %v1983_v63 = vld [vmem:[#allocation3 + $0x290] ss:$8 sps:$4 sm:$0xff]  }
 0x11a   : > { %1339 = vmatprep.subr.bf16.mxu0 %v1868_v0  ;;  %1378 = vmatprep.subr.bf16.mxu1 %v1925_v1  ;;  %v1991_v0 = vld [vmem:[#allocation3 + $0x284] ss:$8 sps:$4 sm:$0xff]   ;;  %v1989_v1 = vld [vmem:[#allocation3 + $0x280] ss:$8 sps:$4 sm:$0xff]  }
 0x11d   : > { %1340 = vmatpush2.bf16.msra.mxu0 %v1866_v2  ;;  %1379 = vmatpush1.bf16.msra.mxu1 %v1923_v3 }
 0x11e   : > { %1341 = vmatprep.subr.bf16.mxu0 %v1871_v4  ;;  %1380 = vmatprep.subr.bf16.mxu1 %v1931_v5 }
 0x121   : > { %1342 = vmatpush2.bf16.msra.mxu0 %v1869_v6  ;;  %1381 = vmatpush2.bf16.msra.mxu1 %v1929_v7 }
 0x122   : > { %1343 = vmatprep.subr.bf16.mxu0 %v1874_v8  ;;  %1382 = vmatprep.subr.bf16.mxu1 %v1937_v9 }
 0x125   : > { %1344 = vmatpush2.bf16.msra.mxu0 %v1872_v10  ;;  %1383 = vmatpush2.bf16.msra.mxu1 %v1935_v11 }
 0x126   : > { %1345 = vmatprep.subr.bf16.mxu0 %v1877_v12  ;;  %1384 = vmatprep.subr.bf16.mxu1 %v1943_v13  ;;  %v1980_v13 = vld [vmem:[#allocation3 + $0x370] ss:$8 sps:$4 sm:$0xff]  }
 0x129   : > { %1346 = vmatpush2.bf16.msra.mxu0 %v1875_v14  ;;  %1385 = vmatpush2.bf16.msra.mxu1 %v1941_v15  ;;  %v1979_v15 = vld [vmem:[#allocation2 + $0xc] ss:$28 sps:$4 sm:$0xff]  }
 0x12a   : > { %1347 = vmatprep.subr.bf16.mxu0 %v1880_v16  ;;  %1386 = vmatprep.subr.bf16.mxu1 %v1949_v17  ;;  %v1988_v17 = vld [vmem:[#allocation3 + $0x364] ss:$8 sps:$4 sm:$0xff]  }
 0x12b   : > { %1396 = vmatprep.mubr.bf16.mxu1 %v1979_v15 }
 0x12d   : > { %1348 = vmatpush2.bf16.msra.mxu0 %v1878_v18  ;;  %1387 = vmatpush2.bf16.msra.mxu1 %v1947_v19 }
 0x12e   : > { %1349 = vmatprep.subr.bf16.mxu0 %v1883_v20  ;;  %1388 = vmatprep.subr.bf16.mxu1 %v1955_v23  ;;  %v1986_v20 = vld [vmem:[#allocation3 + $0x360] ss:$8 sps:$4 sm:$0xff]   ;;  %v1997_v23 = vld [vmem:[#allocation3 + $0x354] ss:$8 sps:$4 sm:$0xff]  }
 0x131   : > { %1350 = vmatpush2.bf16.msra.mxu0 %v1881_v21  ;;  %1389 = vmatpush2.bf16.msra.mxu1 %v1953_v24 }
 0x132   : > { %1351 = vmatprep.subr.bf16.mxu0 %v1886_v22  ;;  %1390 = vmatprep.subr.bf16.mxu1 %v1961_v27  ;;  %v2057_v22 = vmov 0  }
 0x135   : > { %1352 = vmatpush2.bf16.msra.mxu0 %v1884_v25  ;;  %1391 = vmatpush2.bf16.msra.mxu1 %v1959_v28  ;;  %v1995_v25 = vld [vmem:[#allocation3 + $0x350] ss:$8 sps:$4 sm:$0xff]  }
 0x136   : > { %1407 = vmatprep.subr.bf16.mxu0 %v1898_v26  ;;  %1392 = vmatprep.subr.bf16.mxu1 %v1967_v32  ;;  %v1994_v28 = vld [vmem:[#allocation2 + $0x14] ss:$28 sps:$4 sm:$0xff]  }
 0x137   : > { %v2003_v32 = vld [vmem:[#allocation3 + $0x334] ss:$8 sps:$4 sm:$0xff]  }
 0x138   : > { %1354 = vmatmul.mubr.bf16.vlgmr.msra.gmra.mxu0 %v1838_v30  ;;  %v2000_v30 = vld [vmem:[#allocation3 + $0x344] ss:$8 sps:$4 sm:$0xff]  }
 0x139   : > { %1408 = vmatpush1.bf16.msra.mxu0 %v1896_v29  ;;  %1393 = vmatpush2.bf16.msra.mxu1 %v1965_v33  ;;  %v2001_v33 = vld [vmem:[#allocation3 + $0x330] ss:$8 sps:$4 sm:$0xff]  }
 0x13a   : > { %1409 = vmatprep.subr.bf16.mxu0 %v1904_v31  ;;  %1394 = vmatprep.subr.bf16.mxu1 %v1973_v36  ;;  %v1998_v31 = vld [vmem:[#allocation3 + $0x340] ss:$8 sps:$4 sm:$0xff]   ;;  %v2009_v36 = vld [vmem:[#allocation3 + $0x314] ss:$8 sps:$4 sm:$0xff]  }
 0x13b   : > { %1439 = vmatprep.mubr.bf16.mxu0 %v1994_v28 }
 0x13d   : > { %1410 = vmatpush1.bf16.msra.mxu0 %v1902_v34  ;;  %1395 = vmatpush2.bf16.msra.mxu1 %v1971_v37  ;;  %v2006_v34 = vld [vmem:[#allocation3 + $0x324] ss:$8 sps:$4 sm:$0xff]   ;;  %v2007_v37 = vld [vmem:[#allocation3 + $0x310] ss:$8 sps:$4 sm:$0xff]  }
 0x13e   : > { %1411 = vmatprep.subr.bf16.mxu0 %v1910_v35  ;;  %1450 = vmatprep.subr.bf16.mxu1 %v1982_v40  ;;  %v2004_v35 = vld [vmem:[#allocation3 + $0x320] ss:$8 sps:$4 sm:$0xff]  }
 0x141   : > { %1412 = vmatpush1.bf16.msra.mxu0 %v1908_v38  ;;  %v2012_v38 = vld [vmem:[#allocation3 + $0x304] ss:$8 sps:$4 sm:$0xff]  }
 0x142   : > { %1413 = vmatprep.subr.bf16.mxu0 %v1916_v39  ;;  %v2010_v39 = vld [vmem:[#allocation3 + $0x300] ss:$8 sps:$4 sm:$0xff]  }
 0x145   : > { %1414 = vmatpush1.bf16.msra.mxu0 %v1914_v41 }
 0x146   : > { %1415 = vmatprep.subr.bf16.mxu0 %v1922_v42 }
 0x149   : > { %1416 = vmatpush1.bf16.msra.mxu0 %v1920_v43  ;;  %v715_v43 = vlaneseq }
 0x14a   : > { %1417 = vmatprep.subr.bf16.mxu0 %v1928_v44 }
 0x14d   : > { %1418 = vmatpush1.bf16.msra.mxu0 %v1926_v45  ;;  %v716_v45 = vshrl.u32 %v715_v43, 7 }
 0x14e   : > { %1419 = vmatprep.subr.bf16.mxu0 %v1934_v46 }
 0x151   : > { %1420 = vmatpush1.bf16.msra.mxu0 %v1932_v47 }
 0x152   : > { %1421 = vmatprep.subr.bf16.mxu0 %v1940_v48  ;;  %v717_v48 = vsub.s32 0, %v716_v45 }
 0x155   : > { %1422 = vmatpush1.bf16.msra.mxu0 %v1938_v49  ;;  %v721_v49 = vsub.s32 1, %v716_v45 }
 0x156   : > { %1423 = vmatprep.subr.bf16.mxu0 %v1946_v50  ;;  %v713_v50 = vld [vmem:[%s2162_s3] sm:$0x3] }
 0x159   : > { %1424 = vmatpush2.bf16.msra.mxu0 %v1944_v51 }
 0x15a   : > { %1425 = vmatprep.subr.bf16.mxu0 %v1952_v52 }
 0x15d   : > { %1426 = vmatpush2.bf16.msra.mxu0 %v1950_v53  ;;  %v718_v53 = vrot.slane %v713_v50, %v717_v48 }
 0x15e   : > { %1427 = vmatprep.subr.bf16.mxu0 %v1958_v54  ;;  %v722_v54 = vrot.slane %v713_v50, %v721_v49 }
 0x161   : > { %1428 = vmatpush2.bf16.msra.mxu0 %v1956_v55 }
 0x162   : > { %1429 = vmatprep.subr.bf16.mxu0 %v1964_v56 }
 0x165   : > { %1430 = vmatpush2.bf16.msra.mxu0 %v1962_v57 }
 0x166   : > { %1431 = vmatprep.subr.bf16.mxu0 %v1970_v58 }
 0x169   : > { %1432 = vmatpush2.bf16.msra.mxu0 %v1968_v59 }
 0x16a   : > { %1433 = vmatprep.subr.bf16.mxu0 %v1976_v60 }
 0x16d   : > { %1434 = vmatpush2.bf16.msra.mxu0 %v1974_v61 }
 0x16e   : > { %1435 = vmatprep.subr.bf16.mxu0 %v1985_v62 }
 0x171   : > { %1436 = vmatpush2.bf16.msra.mxu0 %v1983_v63 }
 0x172   : > { %1437 = vmatprep.subr.bf16.mxu0 %v1991_v0 }
 0x175   : > { %1438 = vmatpush2.bf16.msra.mxu0 %v1989_v1 }
 0x1b0   : > { %v454_v2 = vpop.f32.mrf.mxu1 }
 0x1b1   : > { %v1749_v3 = vpack.c.bf16 %v454_v2, %v454_v2 }
 0x1b2   : > { %v1791_v4 = vpop.f32.mrf.mxu1 }
 0x1b3   : > { %469 = vst [vmem:[#allocation2 + $0x8] sm:$0xf] %v1749_v3 }
 0x1b4   : > { %v457_v5 = vpop.f32.mrf.mxu1 }
 0x1b5   : > { %v1750_v6 = vpack.c.bf16 %v457_v5, %v457_v5 }
 0x1b6   : > { %v1792_v7 = vpop.f32.mrf.mxu1 }
 0x1b7   : > { %470 = vst [vmem:[#allocation2 + $0x24] sm:$0xf] %v1750_v6 }
 0x1b8   : > { %v515_v8 = vpop.f32.mrf.mxu0 }
 0x1b9   : > { %v1751_v9 = vpack.c.bf16 %v515_v8, %v515_v8 }
 0x1ba   : > { %v1797_v10 = vpop.f32.mrf.mxu0 }
 0x1bb   : > { %530 = vst [vmem:[#allocation2 + $0x10] sm:$0xf] %v1751_v9 }
 0x1bc   : > { %v518_v11 = vpop.f32.mrf.mxu0 }
 0x1bd   : > { %v1752_v12 = vpack.c.bf16 %v518_v11, %v518_v11 }
 0x1be   : > { %v1977_v14 = vld [vmem:[#allocation2 + $0x8] ss:$28 sps:$4 sm:$0xff]   ;;  %v1798_v16 = vpop.f32.mrf.mxu0 }
 0x1bf   : > { %531 = vst [vmem:[#allocation2 + $0x2c] sm:$0xf] %v1752_v12  ;;  %1397 = vmatmul.mubr.bf16.vlgmr.msra.gmra.mxu1 %v1977_v14 }
 0x1c0   : > { %v576_v18 = vpop.f32.mrf.mxu1  ;;  %1451 = vmatpush1.bf16.msra.mxu1 %v1980_v13  ;;  %1482 = vmatprep.mubr.bf16.mxu1 %v2057_v22 }
 0x1c1   : > { %v1753_v19 = vpack.c.bf16 %v576_v18, %v576_v18  ;;  %1452 = vmatprep.subr.bf16.mxu1 %v1988_v17 }
 0x1c2   : > { %v1803_v21 = vpop.f32.mrf.mxu1 }
 0x1c3   : > { %591 = vst [vmem:[#allocation2 + $0x18] sm:$0xf] %v1753_v19 }
 0x1c4   : > { %v579_v24 = vpop.f32.mrf.mxu1  ;;  %1453 = vmatpush1.bf16.msra.mxu1 %v1986_v20 }
 0x1c5   : > { %v1754_v26 = vpack.c.bf16 %v579_v24, %v579_v24  ;;  %1454 = vmatprep.subr.bf16.mxu1 %v1997_v23 }
 0x1c6   : > { %v1992_v27 = vld [vmem:[#allocation2 + $0x10] ss:$28 sps:$4 sm:$0xff]   ;;  %v1804_v29 = vpop.f32.mrf.mxu1 }
 0x1c7   : > { %592 = vst [vmem:[#allocation2 + $0x34] sm:$0xf] %v1754_v26  ;;  %1440 = vmatmul.mubr.bf16.vlgmr.msra.gmra.mxu0 %v1992_v27 }
 0x1c8   : > { %1455 = vmatpush1.bf16.msra.mxu1 %v1995_v25 }
 0x1c9   : > { %1456 = vmatprep.subr.bf16.mxu1 %v2000_v30 }
 0x1cc   : > { %1457 = vmatpush1.bf16.msra.mxu1 %v1998_v31 }
 0x1cd   : > { %1458 = vmatprep.subr.bf16.mxu1 %v2003_v32 }
 0x1ce   : > { %v2013_v40 = vld [vmem:[#allocation2 + $0x18] ss:$28 sps:$4 sm:$0xff]  }
 0x1d0   : > { %1459 = vmatpush1.bf16.msra.mxu1 %v2001_v33 }
 0x1d1   : > { %1460 = vmatprep.subr.bf16.mxu1 %v2006_v34 }
 0x1d4   : > { %1461 = vmatpush1.bf16.msra.mxu1 %v2004_v35 }
 0x1d5   : > { %1462 = vmatprep.subr.bf16.mxu1 %v2009_v36 }
 0x1d8   : > { %1463 = vmatpush1.bf16.msra.mxu1 %v2007_v37 }
 0x1d9   : > { %1464 = vmatprep.subr.bf16.mxu1 %v2012_v38 }
 0x1dc   : > { %1465 = vmatpush1.bf16.msra.mxu1 %v2010_v39 }
 0x1df   : > { %1483 = vmatmul.mubr.bf16.vlgmr.msra.gmra.mxu1 %v2013_v40 }
 0x1f8   : > { %v1355_v41 = vpop.f32.mrf.mxu0 }
 0x1f9   : > { %v1356_v57 = vadd.f32 %v1355_v41, %v718_v53 }
 0x1fa   : > { %v1357_v42 = vpop.f32.mrf.mxu0 }
 0x1fb   : > { %v1358_v58 = vadd.f32 %v1357_v42, %v722_v54 }
 0x1fc   : > { %v1359_v44 = vpop.f32.mrf.mxu0 }
 0x1fd   : > { %v1360_v0 = vadd.f32 %v1359_v44, %v718_v53 }
 0x1fe   : > { %v1361_v47 = vpop.f32.mrf.mxu0 }
 0x1ff   : > { %v1362_v1 = vadd.f32 %v1361_v47, %v722_v54 }
 0x27f   : > { %v1398_v46 = vpop.f32.mrf.mxu1 }
 0x280   : > { %v1399_v61 = vadd.f32 %v1398_v46, %v1356_v57 }
 0x281   : > { %v1400_v51 = vpop.f32.mrf.mxu1 }
 0x282   : > { %v1401_v62 = vadd.f32 %v1400_v51, %v1358_v58 }
 0x283   : > { %v1402_v55 = vpop.f32.mrf.mxu1 }
 0x284   : > { %v1403_v6 = vadd.f32 %v1402_v55, %v1360_v0 }
 0x285   : > { %v1404_v59 = vpop.f32.mrf.mxu1 }
 0x286   : > { %v1405_v7 = vadd.f32 %v1404_v59, %v1362_v1 }
 0x287   : > { %v1441_v52 = vpop.f32.mrf.mxu0 }
 0x288   : > { %v1442_v2 = vadd.f32 %v1441_v52, %v1399_v61 }
 0x289   : > { %v1443_v56 = vpop.f32.mrf.mxu0 }
 0x28a   : > { %v1444_v3 = vadd.f32 %v1443_v56, %v1401_v62 }
 0x28b   : > { %v1445_v60 = vpop.f32.mrf.mxu0 }
 0x28c   : > { %v1446_v11 = vadd.f32 %v1445_v60, %v1403_v6 }
 0x28d   : > { %v1447_v4 = vpop.f32.mrf.mxu0 }
 0x28e   : > { %v1448_v12 = vadd.f32 %v1447_v4, %v1405_v7 }
 0x29f   : > { %v1484_v63 = vpop.f32.mrf.mxu1 }
 0x2a0   : > { %v1485_v8 = vadd.f32 %v1484_v63, %v1442_v2 }
 0x2a1   : > { %v1486_v5 = vpop.f32.mrf.mxu1 }
 0x2a2   : > { %v1487_v9 = vadd.f32 %v1486_v5, %v1444_v3 }
 0x2a3   : > { %v1488_v10 = vpop.f32.mrf.mxu1 }
 0x2a4   : > { %v1755_v13 = vpack.c.bf16 %v1487_v9, %v1485_v8  ;;  %v1489_v15 = vadd.f32 %v1488_v10, %v1446_v11 }
 0x2a5   : > { %v1490_v14 = vpop.f32.mrf.mxu1 }
 0x2a6   : > { %1505 = vst [vmem:[%s212_s22] sm:$0xff] %v1755_v13  ;;  %v1491_v16 = vadd.f32 %v1490_v14, %v1448_v12 }
 0x2a8   : > { %v1756_v17 = vpack.c.bf16 %v1491_v16, %v1489_v15 }
 0x2aa   : > { %1506 = vst [vmem:[%s212_s22 + $0x8] sm:$0xff] %v1756_v17 }
 0x2ab PF: > { %s15_s15 = sadd.s32 1, %s2050_s15  }
 0x2ac   : > { %p12_p1 = scmp.ge.s32.totalorder %s15_s15, 4  }
 0x2ae   :  { %14 = sbr.rel (!%p12_p1) target bundleno = 1 (0x1), region = 73 }
 0x2b3   :  { %1528 = vsyncpa [#allocation4], 1 }
 0x2b4   :  { %1530 = vsyncpa [#allocation4 + $0x1], 1 }

</bundles_post_ra>
